<compile_context>
chip_gen: v7x
topology: tpu7x:2x2x1
jax: 0.10.0
libtpu: 0.0.40
codegen_flags: <defaults>
</compile_context>

<pallas_src>
import math

import jax
import jax.numpy as jnp
from jax.experimental import pallas as pl
from jax.experimental.pallas import tpu as pltpu


def _attention_core_kernel(x_ref, q_ref, rel_ref, wk_ref, bk_ref, wv_ref, bv_ref, out_ref):
    """One (batch, head) grid step: K/V projection + scores + softmax + context."""
    x = x_ref[0]                           # (S, H)  bf16
    wk = wk_ref[0]                         # (H, d)  bf16  (this head)
    wv = wv_ref[0]                         # (H, d)  bf16  (this head)

    # Per-head K / V projections on the MXU, f32 accumulation, bias in f32.
    k = (jnp.dot(x, wk, preferred_element_type=jnp.float32) + bk_ref[0]).astype(jnp.bfloat16)
    v = (jnp.dot(x, wv, preferred_element_type=jnp.float32) + bv_ref[0]).astype(jnp.bfloat16)

    # q is pre-scaled by 1/sqrt(d) in the wrapper; rel already carries that scale too.
    q = q_ref[0, 0]                        # (S, d) bf16
    scores = jnp.dot(q, k.T, preferred_element_type=jnp.float32) + rel_ref[0, 0]  # (S, S) f32

    # Numerically stable softmax: max/exp/sum on VPU+EUP, denominator via approx reciprocal.
    m = jnp.max(scores, axis=-1, keepdims=True)
    e = jnp.exp(scores - m)
    probs = e * pl.reciprocal(jnp.sum(e, axis=-1, keepdims=True), approx=True)

    # context = probs @ V on the MXU.
    ctx = jnp.dot(probs.astype(jnp.bfloat16), v, preferred_element_type=jnp.float32)
    out_ref[0, 0] = ctx.astype(out_ref.dtype)


def attention_header_forward(hidden_states, params, num_heads, max_position_embeddings):
    """hidden_states: (B, S, H) float32.  Returns context_layer (B, S, H) float32."""
    B, S, H = hidden_states.shape
    d = H // num_heads
    M = max_position_embeddings
    inv_sqrt_d = 1.0 / math.sqrt(d)

    wq, bq = params["wq"], params["bq"]   # weights pre-transposed: (in_features, out_features)
    wk, bk = params["wk"], params["bk"]
    wv, bv = params["wv"], params["bv"]
    dist_table = params["distance_embedding"].astype(jnp.float32)   # (2M-1, d)

    # ---------- glue (plain JAX / XLA): q projection + relative-key scores ----------
    # q scaled once by 1/sqrt(d); both QK^T and the relative term are linear in q.
    q = (hidden_states @ wq + bq) * inv_sqrt_d                        # (B, S, H) f32
    q_heads = q.reshape(B, S, num_heads, d).transpose(0, 2, 1, 3)     # (B, h, S, d)

    # MXU-friendly: project q onto the whole distance table once ...
    rel_all = jnp.einsum("bhld,kd->bhlk", q_heads, dist_table)        # (B, h, S, 2M-1)

    # ... then gather columns by the (S, S) distance index.
    # TODO(synk): this data-dependent gather has no robust Mosaic lowering; it stays in XLA.
    pos = jnp.arange(S, dtype=jnp.int32)
    distance = pos[:, None] - pos[None, :]
    distance = distance.at[0, :].set(0)
    distance = distance.at[:, 0].set(0)
    distance = jnp.minimum(distance, M - 1) + (M - 1)
    distance = jnp.maximum(distance, 0)
    idx = jnp.broadcast_to(distance[None, None], (B, num_heads, S, S))
    rel = jnp.take_along_axis(rel_all, idx, axis=3).astype(jnp.float32)   # (B, h, S, S)

    # ---------- per-head K / V weights (no in-kernel lane slicing) ----------
    wk_h = wk.reshape(H, num_heads, d).transpose(1, 0, 2).astype(jnp.bfloat16)   # (h, H, d)
    wv_h = wv.reshape(H, num_heads, d).transpose(1, 0, 2).astype(jnp.bfloat16)   # (h, H, d)
    bk_h = bk.reshape(num_heads, 1, d)                                           # (h, 1, d) f32
    bv_h = bv.reshape(num_heads, 1, d)                                           # (h, 1, d) f32

    # bf16 at the MXU inputs (halves DMA for x/q/weights); accumulation stays f32.
    x_bf = hidden_states.astype(jnp.bfloat16)
    q_bf = q_heads.astype(jnp.bfloat16)

    grid_spec = pltpu.PrefetchScalarGridSpec(
        num_scalar_prefetch=0,
        grid=(B, num_heads),
        in_specs=[
            pl.BlockSpec((1, S, H), lambda b, h: (b, 0, 0)),            # x (bf16); constant over h
            pl.BlockSpec((1, 1, S, d), lambda b, h: (b, h, 0, 0)),      # q (bf16, pre-scaled)
            pl.BlockSpec((1, 1, S, S), lambda b, h: (b, h, 0, 0)),      # relative scores (f32)
            pl.BlockSpec((1, H, d), lambda b, h: (h, 0, 0)),            # K weights, this head
            pl.BlockSpec((1, 1, d), lambda b, h: (h, 0, 0)),            # K bias,    this head
            pl.BlockSpec((1, H, d), lambda b, h: (h, 0, 0)),            # V weights, this head
            pl.BlockSpec((1, 1, d), lambda b, h: (h, 0, 0)),            # V bias,    this head
        ],
        out_specs=pl.BlockSpec((1, 1, S, d), lambda b, h: (b, h, 0, 0)),
    )

    ctx = pl.pallas_call(
        _attention_core_kernel,
        out_shape=jax.ShapeDtypeStruct((B, num_heads, S, d), jnp.float32),
        grid_spec=grid_spec,
        compiler_params=pltpu.CompilerParams(
            dimension_semantics=("parallel", "parallel")),
    )(x_bf, q_bf, rel, wk_h, bk_h, wv_h, bv_h)

    # permute(0, 2, 1, 3) + view(B, S, all_head_size) — head interleave done in the wrapper.
    return ctx.transpose(0, 2, 1, 3).reshape(B, S, H)


def reference_forward(hidden_states, params, num_heads, max_position_embeddings):
    """Pure-JAX f32 reference mirroring the PyTorch forward (self-attn, no masks, p_drop=0)."""
    B, S, H = hidden_states.shape
    d = H // num_heads

    def proj(x, w, b):
        return x @ w + b  # w already (in, out)

    q = proj(hidden_states, params["wq"], params["bq"])
    k = proj(hidden_states, params["wk"], params["bk"])
    v = proj(hidden_states, params["wv"], params["bv"])

    def split_heads(x):
        return x.reshape(B, S, num_heads, d).transpose(0, 2, 1, 3)  # (B, h, S, d)

    q, k, v = split_heads(q), split_heads(k), split_heads(v)
    scores = jnp.einsum("bhld,bhrd->bhlr", q, k)

    pos_l = jnp.arange(S, dtype=jnp.int32)[:, None]
    pos_r = jnp.arange(S, dtype=jnp.int32)[None, :]
    distance = pos_l - pos_r
    distance = distance.at[0, :].set(0).at[:, 0].set(0)
    distance = jnp.minimum(distance, max_position_embeddings - 1) + (max_position_embeddings - 1)
    distance = jnp.maximum(distance, 0)
    pos_emb = jnp.take(params["distance_embedding"], distance, axis=0)  # (S, S, d)

    rel = jnp.einsum("bhld,lrd->bhlr", q, pos_emb)
    scores = (scores + rel) / math.sqrt(d)
    probs = jax.nn.softmax(scores, axis=-1)
    ctx = jnp.einsum("bhlr,bhrd->bhld", probs, v)
    ctx = ctx.transpose(0, 2, 1, 3).reshape(B, S, H)
    return ctx


if __name__ == "__main__":
    # Small shapes consistent with the module: batch=2, seq=8, hidden=32, heads=2.
    B, S, H = 2, 8, 32
    num_heads = 2
    head_size = H // num_heads
    max_position_embeddings = 128

    key = jax.random.PRNGKey(0)
    ks = jax.random.split(key, 8)
    scale = 0.05
    params = {
        # Linear weights stored pre-transposed as (in_features, out_features).
        "wq": scale * jax.random.normal(ks[0], (H, H), jnp.float32),
        "wk": scale * jax.random.normal(ks[1], (H, H), jnp.float32),
        "wv": scale * jax.random.normal(ks[2], (H, H), jnp.float32),
        "bq": scale * jax.random.normal(ks[3], (1, H), jnp.float32),
        "bk": scale * jax.random.normal(ks[4], (1, H), jnp.float32),
        "bv": scale * jax.random.normal(ks[5], (1, H), jnp.float32),
        "distance_embedding": scale * jax.random.normal(
            ks[6], (2 * max_position_embeddings - 1, head_size), jnp.float32),
    }
    hidden_states = jax.random.normal(ks[7], (B, S, H), jnp.float32)

    out = attention_header_forward(hidden_states, params, num_heads, max_position_embeddings)
    out = jax.block_until_ready(out)

    ref = reference_forward(hidden_states, params, num_heads, max_position_embeddings)
    assert out.shape == (B, S, H)
    # bf16 MXU inputs + approx reciprocal => loosen tolerance vs. the f32 reference.
    assert jnp.allclose(out, ref, atol=3e-2, rtol=3e-2), "mismatch vs reference"

    print("KERNEL_OK")
</pallas_src>

<mosaic_0001>
module attributes {stable_mosaic.version = 11 : i64} {
  func.func @_attention_core_kernel(%arg0: i32, %arg1: i32, %arg2: memref<1x8x32xbf16, #tpu.memory_space<vmem>>, %arg3: memref<1x1x8x16xbf16, #tpu.memory_space<vmem>>, %arg4: memref<1x1x8x8xf32, #tpu.memory_space<vmem>>, %arg5: memref<1x32x16xbf16, #tpu.memory_space<vmem>>, %arg6: memref<1x1x16xf32, #tpu.memory_space<vmem>>, %arg7: memref<1x32x16xbf16, #tpu.memory_space<vmem>>, %arg8: memref<1x1x16xf32, #tpu.memory_space<vmem>>, %arg9: memref<1x1x8x16xf32, #tpu.memory_space<vmem>>) attributes {dimension_semantics = [#tpu.dimension_semantics<parallel>, #tpu.dimension_semantics<parallel>], iteration_bounds = array<i64: 2, 2>, scalar_prefetch = 0 : i64, scratch_operands = 0 : i64, tpu.core_type = #tpu.core_type<tc>, window_params = [{transform_indices = @transform_0, window_bounds = array<i64: 1, 8, 32>}, {transform_indices = @transform_1, window_bounds = array<i64: 1, 1, 8, 16>}, {transform_indices = @transform_2, window_bounds = array<i64: 1, 1, 8, 8>}, {transform_indices = @transform_3, window_bounds = array<i64: 1, 32, 16>}, {transform_indices = @transform_4, window_bounds = array<i64: 1, 1, 16>}, {transform_indices = @transform_5, window_bounds = array<i64: 1, 32, 16>}, {transform_indices = @transform_6, window_bounds = array<i64: 1, 1, 16>}, {transform_indices = @transform_7, window_bounds = array<i64: 1, 1, 8, 16>}]} {
    %c0 = arith.constant 0 : index
    %c0_0 = arith.constant 0 : index
    %c0_1 = arith.constant 0 : index
    %0 = vector.load %arg2[%c0, %c0_0, %c0_1] : memref<1x8x32xbf16, #tpu.memory_space<vmem>>, vector<1x8x32xbf16>
    %1 = vector.shape_cast %0 : vector<1x8x32xbf16> to vector<8x32xbf16>
    %c0_2 = arith.constant 0 : index
    %c0_3 = arith.constant 0 : index
    %c0_4 = arith.constant 0 : index
    %2 = vector.load %arg5[%c0_2, %c0_3, %c0_4] : memref<1x32x16xbf16, #tpu.memory_space<vmem>>, vector<1x32x16xbf16>
    %3 = vector.shape_cast %2 : vector<1x32x16xbf16> to vector<32x16xbf16>
    %c0_5 = arith.constant 0 : index
    %c0_6 = arith.constant 0 : index
    %c0_7 = arith.constant 0 : index
    %4 = vector.load %arg7[%c0_5, %c0_6, %c0_7] : memref<1x32x16xbf16, #tpu.memory_space<vmem>>, vector<1x32x16xbf16>
    %5 = vector.shape_cast %4 : vector<1x32x16xbf16> to vector<32x16xbf16>
    %cst = arith.constant dense<0.000000e+00> : vector<8x16xf32>
    %6 = tpu.matmul %1, %3, %cst {dimension_numbers = #tpu.dot_dimension_numbers<[1], [0], [0], [1], [0, 0, 1, 1], [], []>} : vector<8x32xbf16>, vector<32x16xbf16>, vector<8x16xf32> -> vector<8x16xf32>
    %c0_8 = arith.constant 0 : index
    %c0_9 = arith.constant 0 : index
    %c0_10 = arith.constant 0 : index
    %7 = vector.load %arg6[%c0_8, %c0_9, %c0_10] : memref<1x1x16xf32, #tpu.memory_space<vmem>>, vector<1x1x16xf32>
    %8 = vector.shape_cast %7 : vector<1x1x16xf32> to vector<1x16xf32>
    %9 = vector.broadcast %8 : vector<1x16xf32> to vector<8x16xf32>
    %10 = arith.addf %6, %9 : vector<8x16xf32>
    %11 = arith.truncf %10 : vector<8x16xf32> to vector<8x16xbf16>
    %cst_11 = arith.constant dense<0.000000e+00> : vector<8x16xf32>
    %12 = tpu.matmul %1, %5, %cst_11 {dimension_numbers = #tpu.dot_dimension_numbers<[1], [0], [0], [1], [0, 0, 1, 1], [], []>} : vector<8x32xbf16>, vector<32x16xbf16>, vector<8x16xf32> -> vector<8x16xf32>
    %c0_12 = arith.constant 0 : index
    %c0_13 = arith.constant 0 : index
    %c0_14 = arith.constant 0 : index
    %13 = vector.load %arg8[%c0_12, %c0_13, %c0_14] : memref<1x1x16xf32, #tpu.memory_space<vmem>>, vector<1x1x16xf32>
    %14 = vector.shape_cast %13 : vector<1x1x16xf32> to vector<1x16xf32>
    %15 = vector.broadcast %14 : vector<1x16xf32> to vector<8x16xf32>
    %16 = arith.addf %12, %15 : vector<8x16xf32>
    %17 = arith.truncf %16 : vector<8x16xf32> to vector<8x16xbf16>
    %c0_15 = arith.constant 0 : index
    %c0_16 = arith.constant 0 : index
    %c0_17 = arith.constant 0 : index
    %c0_18 = arith.constant 0 : index
    %18 = vector.load %arg3[%c0_15, %c0_16, %c0_17, %c0_18] : memref<1x1x8x16xbf16, #tpu.memory_space<vmem>>, vector<1x1x8x16xbf16>
    %19 = vector.shape_cast %18 : vector<1x1x8x16xbf16> to vector<8x16xbf16>
    %20 = tpu.transpose %11, [1, 0] : vector<8x16xbf16> -> vector<16x8xbf16>
    %cst_19 = arith.constant dense<0.000000e+00> : vector<8x8xf32>
    %21 = tpu.matmul %19, %20, %cst_19 {dimension_numbers = #tpu.dot_dimension_numbers<[1], [0], [0], [1], [0, 0, 1, 1], [], []>} : vector<8x16xbf16>, vector<16x8xbf16>, vector<8x8xf32> -> vector<8x8xf32>
    %c0_20 = arith.constant 0 : index
    %c0_21 = arith.constant 0 : index
    %c0_22 = arith.constant 0 : index
    %c0_23 = arith.constant 0 : index
    %22 = vector.load %arg4[%c0_20, %c0_21, %c0_22, %c0_23] : memref<1x1x8x8xf32, #tpu.memory_space<vmem>>, vector<1x1x8x8xf32>
    %23 = vector.shape_cast %22 : vector<1x1x8x8xf32> to vector<8x8xf32>
    %24 = arith.addf %21, %23 : vector<8x8xf32>
    %cst_24 = arith.constant dense<0xFF800000> : vector<8xf32>
    %25 = vector.multi_reduction <maximumf>, %24, %cst_24 [1] : vector<8x8xf32> to vector<8xf32>
    %26 = vector.shape_cast %25 : vector<8xf32> to vector<8x1xf32>
    %27 = vector.broadcast %26 : vector<8x1xf32> to vector<8x8xf32>
    %28 = arith.subf %24, %27 : vector<8x8xf32>
    %29 = math.exp %28 : vector<8x8xf32>
    %cst_25 = arith.constant dense<0.000000e+00> : vector<8xf32>
    %30 = vector.multi_reduction <add>, %29, %cst_25 [1] : vector<8x8xf32> to vector<8xf32>
    %31 = vector.shape_cast %30 : vector<8xf32> to vector<8x1xf32>
    %32 = tpu.reciprocal %31 {approx = true} : vector<8x1xf32> -> vector<8x1xf32>
    %33 = vector.broadcast %32 : vector<8x1xf32> to vector<8x8xf32>
    %34 = arith.mulf %29, %33 : vector<8x8xf32>
    %35 = arith.truncf %34 : vector<8x8xf32> to vector<8x8xbf16>
    %cst_26 = arith.constant dense<0.000000e+00> : vector<8x16xf32>
    %36 = tpu.matmul %35, %17, %cst_26 {dimension_numbers = #tpu.dot_dimension_numbers<[1], [0], [0], [1], [0, 0, 1, 1], [], []>} : vector<8x8xbf16>, vector<8x16xbf16>, vector<8x16xf32> -> vector<8x16xf32>
    %c0_27 = arith.constant 0 : index
    %c0_28 = arith.constant 0 : index
    %c0_29 = arith.constant 0 : index
    %c0_30 = arith.constant 0 : index
    %37 = vector.load %arg9[%c0_27, %c0_28, %c0_29, %c0_30] : memref<1x1x8x16xf32, #tpu.memory_space<vmem>>, vector<1x1x8x16xf32>
    %38 = vector.shape_cast %37 : vector<1x1x8x16xf32> to vector<8x16xf32>
    %39 = vector.shape_cast %36 : vector<8x16xf32> to vector<1x1x8x16xf32>
    tpu.vector_store %arg9[%c0_27, %c0_28, %c0_29, %c0_30], %39 {strides = array<i32>} : memref<1x1x8x16xf32, #tpu.memory_space<vmem>>, vector<1x1x8x16xf32>,
    return
  }
  func.func @transform_0(%arg0: i32, %arg1: i32) -> (i32, i32, i32) {
    %c0_i32 = arith.constant 0 : i32
    %c0_i32_0 = arith.constant 0 : i32
    %c0_i32_1 = arith.constant 0 : i32
    return %arg0, %c0_i32, %c0_i32_0 : i32, i32, i32
  }
  func.func @transform_1(%arg0: i32, %arg1: i32) -> (i32, i32, i32, i32) {
    %c0_i32 = arith.constant 0 : i32
    %c0_i32_0 = arith.constant 0 : i32
    %c0_i32_1 = arith.constant 0 : i32
    return %arg0, %arg1, %c0_i32, %c0_i32_0 : i32, i32, i32, i32
  }
  func.func @transform_2(%arg0: i32, %arg1: i32) -> (i32, i32, i32, i32) {
    %c0_i32 = arith.constant 0 : i32
    %c0_i32_0 = arith.constant 0 : i32
    %c0_i32_1 = arith.constant 0 : i32
    return %arg0, %arg1, %c0_i32, %c0_i32_0 : i32, i32, i32, i32
  }
  func.func @transform_3(%arg0: i32, %arg1: i32) -> (i32, i32, i32) {
    %c0_i32 = arith.constant 0 : i32
    %c0_i32_0 = arith.constant 0 : i32
    %c0_i32_1 = arith.constant 0 : i32
    return %arg1, %c0_i32, %c0_i32_0 : i32, i32, i32
  }
  func.func @transform_4(%arg0: i32, %arg1: i32) -> (i32, i32, i32) {
    %c0_i32 = arith.constant 0 : i32
    %c0_i32_0 = arith.constant 0 : i32
    %c0_i32_1 = arith.constant 0 : i32
    return %arg1, %c0_i32, %c0_i32_0 : i32, i32, i32
  }
  func.func @transform_5(%arg0: i32, %arg1: i32) -> (i32, i32, i32) {
    %c0_i32 = arith.constant 0 : i32
    %c0_i32_0 = arith.constant 0 : i32
    %c0_i32_1 = arith.constant 0 : i32
    return %arg1, %c0_i32, %c0_i32_0 : i32, i32, i32
  }
  func.func @transform_6(%arg0: i32, %arg1: i32) -> (i32, i32, i32) {
    %c0_i32 = arith.constant 0 : i32
    %c0_i32_0 = arith.constant 0 : i32
    %c0_i32_1 = arith.constant 0 : i32
    return %arg1, %c0_i32, %c0_i32_0 : i32, i32, i32
  }
  func.func @transform_7(%arg0: i32, %arg1: i32) -> (i32, i32, i32, i32) {
    %c0_i32 = arith.constant 0 : i32
    %c0_i32_0 = arith.constant 0 : i32
    %c0_i32_1 = arith.constant 0 : i32
    return %arg0, %arg1, %c0_i32, %c0_i32_0 : i32, i32, i32, i32
  }
}

</mosaic_0001>

<bundles_post_ra>
// kernel: tpu_custom_call.1
= control target key start
LH: loop header
LB: loop body
LE: loop exit
PB: predicated region body
PF: predicated region fallthrough
CT: control target
= control target key end

     0   :  { %s1295_s0 = inlined_call_operand.vmem [shape: bf16[2,8,32], index: 0, kind: input, shape index: {}]   ;;  %s1296_s1 = inlined_call_operand.vmem [shape: bf16[2,2,8,16], index: 1, kind: input, shape index: {}]   ;;  %s1297_s2 = inlined_call_operand.vmem [shape: f32[2,2,8,8], index: 2, kind: input, shape index: {}]   ;;  %s1298_s3 = inlined_call_operand.vmem [shape: bf16[2,32,16], index: 3, kind: input, shape index: {}]   ;;  %s1299_s4 = inlined_call_operand.vmem [shape: f32[2,1,16], index: 4, kind: input, shape index: {}]   ;;  %s1300_s5 = inlined_call_operand.vmem [shape: bf16[2,32,16], index: 5, kind: input, shape index: {}]   ;;  %s1301_s6 = inlined_call_operand.vmem [shape: f32[2,1,16], index: 6, kind: input, shape index: {}]   ;;  %s1302_s7 = inlined_call_operand.hbm [shape: f32[2,2,8,16], index: 7, kind: output, shape index: {}]  }
   0x1   :  { %1304 = sst [smem:[#allocation5_spill]] %s1298_s3 }
   0x2   :  { %12 = vsyncpa [#allocation3], 0 }
   0x3   :  { %14 = vsyncpa [#allocation3 + $0x1], 0  ;;  %s1118_s24 = smov 0   ;;  %s1120_s25 = smov 0  }
   0x4   :  { %s1122_s26 = smov 0   ;;  %s1124_s27 = smov 0  }
   0x5   :  { %s1126_s28 = smov 0   ;;  %s1128_s29 = smov 0  }
   0x6   :  { %s1130_s30 = smov 0   ;;  %s1132_s8 = smov 0  }
   0x7 LB: > { %s828_s9 = sadd.s32 4294967295, %s1073_s8   ;;  %s829_s10 = sadd.s32 4294967294, %s1073_s8   ;;  %s1073_s8 = sphi %s1132_s8, %s20_s8   ;;  %s1069_s30 = sphi %s1130_s30, %s1315_s30   ;;  %s1065_s29 = sphi %s1128_s29, %s1314_s29   ;;  %s1061_s28 = sphi %s1126_s28, %s1313_s28   ;;  %s1057_s27 = sphi %s1124_s27, %s1312_s27   ;;  %s1053_s26 = sphi %s1122_s26, %s1311_s26   ;;  %s1049_s25 = sphi %s1120_s25, %s1310_s25   ;;  %s1045_s24 = sphi %s1118_s24, %s1309_s24  }
   0x8   : > { %s29_s11 = sadd.s32 1, %s1065_s29  ;;  %s32_s12 = sadd.s32 1, %s1069_s30 }
   0x9   : > { %p30_p0 = scmp.ge.s32.totalorder %s29_s11, 2  ;;  %p237_p1 = scmp.ne.s32.totalorder %s1053_s26, %s1049_s25 }
   0xa   : > { %p238_p2 = scmp.eq.s32.totalorder %s828_s9, 3  ;;  %p243_p5 = scmp.ne.s32.totalorder %s1049_s25, %s1045_s24 }
   0xb   : > { %s1317_s11 = smov (%p30_p0, %s29_s11), 0  ;;  %s1319_s12 = smov (!%p30_p0, %s32_s12), %s1069_s30 }
   0xc   : > { %s223_s13 = ssub.s32 %s1065_s29, %s1317_s11  ;;  %p1169_p3 = por %p238_p2, %p237_p1 }
   0xd   : > { %p34_p4 = scmp.ge.s32.totalorder %s1319_s12, 2  ;;  %p244_p6 = scmp.eq.s32.totalorder %s829_s10, 3 }
   0xe   : > { %p832_p7 = scmp.ge.s32.totalorder %s1073_s8, 1  ;;  %p319_p9 = scmp.lt.s32.totalorder %s1073_s8, 5 }
   0xf   : > { %s1321_s12 = smov (%p34_p4, %s1319_s12), 0  ;;  %p1178_p8 = por %p244_p6, %p243_p5 }
  0x10   : > { %s222_s16 = ssub.s32 %s1069_s30, %s1321_s12  ;;  %s227_s17 = sadd.s32 1, %s1053_s26 }
  0x11   : > { %s224_s18 = sor.u32 %s223_s13, %s222_s16  ;;  %p320_p10 = pnand %p832_p7, %p319_p9 }
  0x12   : > { %p225_p11 = scmp.eq.s32.totalorder %s224_s18, 0  ;;  %p388_p12 = scmp.lt.s32.totalorder (!%p320_p10), %s1057_s27, 1  ;;  %v1075_v0 = vmov (!%p320_p10), 0.0   ;;  %vm1076_vm0 = vmmov (!%p320_p10), 0   ;;  %vm447_vm1 = vcmask (!%p320_p10), 261120   ;;  %vm554_vm2 = vcmask (!%p320_p10), 130048  }
  0x13   : > { %323 = sbr.rel (%p320_p10) target bundleno = 1019 (0x3fb), region = 48  ;;  %p382_p13 = scmp.lt.s32.totalorder (!%p320_p10), %s1061_s28, 1  ;;  %870 = vmatprep.subr.bf16.mxu0 (!%p320_p10), %v1075_v0  ;;  %874 = vmatprep.mubr.msk.bf16.mxu0 (!%p320_p10), %vm1076_vm0, %v1075_v0  ;;  %vm601_vm3 = vcmask (!%p320_p10), 64512   ;;  %vm617_vm4 = vcmask (!%p320_p10), 1043456  }
  0x14   : > { %s1187_s19 = scalar_select %p225_p11, %s1053_s26, %s227_s17  }
  0x15   : > { %878 = vmatprep.subr.bf16.mxu1 (!%p320_p10), %v1075_v0  ;;  %882 = vmatprep.mubr.msk.bf16.mxu1 (!%p320_p10), %vm1076_vm0, %v1075_v0  ;;  %s1307_s3 = sld [smem:[#allocation5_spill]] (!%p320_p10)  ;;  %s854_s23 = sshll.u32 (!%p320_p10), %s1061_s28, 1 }
  0x1a   : > { %s1193_s20 = scalar_select %p388_p12, %s1057_s27, 1 }
  0x1b   : > { %s383_s21 = scalar_select %p382_p13, %s1061_s28, 1 }
  0x1c   : > { %s1303_s22 = sshll.u32 %s1193_s20, 4 }
  0x1d   : > { %s406_s10 = scalar_lea.vmem %s1307_s3, %s1303_s22  ;;  %s834_s13 = sshll.u32 %s383_s21, 2 }
  0x1e   : > { %v971_v1 = vld [vmem:[%s406_s10] sm:$0xff]   ;;  %v972_v2 = vld [vmem:[%s406_s10 + $0x8] sm:$0xff]   ;;  %s385_s18 = scalar_lea.vmem %s1295_s0, %s834_s13  ;;  %s409_s22 = scalar_lea.vmem %s1299_s4, %s1193_s20 }
  0x1f   : > { %871 = vmatpush3.bf16.msra.mxu0 %v971_v1  ;;  %v419_v3 = vld [vmem:[%s385_s18] sm:$0xf]  ;;  %s835_s3 = sshll.u32 %s383_s21, 1  ;;  %s1308_s21 = sshll.u32 %s1193_s20, 4 }
  0x20   : > { %872 = vmatprep.subr.bf16.mxu0 %v1075_v0  ;;  %v843_v4 = vld [vmem:[%s409_s22] ss:$0 sm:$0xff]  ;;  %s391_s10 = sadd.s32 %s835_s3, %s1193_s20  ;;  %s414_s3 = scalar_lea.vmem %s1300_s5, %s1308_s21 }
  0x21   : > { %s836_s13 = sshll.u32 %s391_s10, 2  ;;  %v973_v13 = vld [vmem:[%s414_s3] sm:$0xff]   ;;  %v974_v14 = vld [vmem:[%s414_s3 + $0x8] sm:$0xff]   ;;  %s838_s9 = sshll.u32 %s391_s10, 3 }
  0x22   : > { %s393_s18 = scalar_lea.vmem %s1296_s1, %s836_s13  ;;  %879 = vmatpush3.bf16.msra.mxu1 %v973_v13  ;;  %s401_s17 = scalar_lea.vmem %s1297_s2, %s838_s9 }
  0x23   : > { %873 = vmatpush3.bf16.msra.mxu0 %v972_v2  ;;  %v552_v12 = vld [vmem:[%s393_s18] sm:$0xf]  ;;  %880 = vmatprep.subr.bf16.mxu1 %v1075_v0  ;;  %s417_s22 = scalar_lea.vmem %s1301_s6, %s1193_s20  ;;  %s379_s20 = sand.u32 1, %s1049_s25  }
  0x24   : > { %886 = vmatprep.subr.bf16.mxu0 %v1075_v0  ;;  %v553_v15 = vld [vmem:[%s401_s17] sm:$0xff]  ;;  %s833_s10 = sshll.u32 %s379_s20, 3  ;;  %s674_s3 = sadd.s32 %s1057_s27, %s854_s23 }
  0x25   : > { %v847_v22 = vld [vmem:[%s417_s22] ss:$0 sm:$0xff]  ;;  %s855_s9 = sshll.u32 %s674_s3, 7  ;;  %s381_s13 = scalar_lea.vmem [#allocation2], %s833_s10 }
  0x26   : > { %875 = vmatmul.mubr.msk.bf16.vlgmr.msra.gmra.mrb[0].mxu0 %vm447_vm1, %v419_v3  ;;  %881 = vmatpush3.bf16.msra.mxu1 %v974_v14  ;;  %s678_s16 = sshll.u32 %s381_s13, 4  ;;  %s1241_s21 = scalar_lea.hbm %s1302_s7, %s855_s9  ;;  %s1243_s16 = int_to_ptr.vmem [resolvable:$true] %s678_s16 }
  0x27   : > { %888 = vmatprep.mubr.msk.bf16.mxu0 %vm1076_vm0, %v1075_v0  ;;  %892 = vmatprep.subr.bf16.mxu1 %v1075_v0  ;;  %s663_s28 = scalar_lea.sflag [#allocation3], %s379_s20  ;;  %s979_s27 = scalar_lea.vmem %s1243_s16, 128 }
  0x28   : > { %p980_p0 = scmp.ne.s32.totalorder %s1243_s16, %s979_s27  ;;  %s1077_s22 = smov [#allocation2]  }
  0x29   : > { %883 = vmatmul.mubr.msk.bf16.vlgmr.msra.gmra.mrb[0].mxu1 %vm447_vm1, %v419_v3  ;;  %s983_s10 = sshll.u32 %s1077_s22, 4  ;;  %s984_s10 = int_to_ptr.vmem [resolvable:$false] %s983_s10 }
  0x2a   : > { %894 = vmatprep.mubr.msk.bf16.mxu1 %vm1076_vm0, %v1075_v0  ;;  %p981_p1 = pnand %p980_p0, %p1169_p3  ;;  %s985_s23 = scalar_lea.vmem %s984_s10, 256 }
  0x2b   : > { %p986_p4 = scmp.lt.s32.totalorder %s1243_s16, %s984_s10  ;;  %p987_p5 = scmp.lt.s32.totalorder %s985_s23, %s979_s27 }
  0x2c   : > { %p982_p2 = pneg %p981_p1 }
  0x2d   : > { %p988_p6 = por %p987_p5, %p986_p4 }
  0x2f   : > { %p989_p7 = pnand %p988_p6, %p982_p2 }
  0xf9   : > { %v485_v5 = vpop.f32.mrb[0].mxu0 }
  0xfa   : > { %v486_v6 = vadd.f32 %v843_v4, %v485_v5  ;;  %v876_v7 = vpop.f32.mrb[1].mxu0 }
  0xfb   : > { %v488_v8 = vpop.f32.mrb[2].mxu0 }
  0xfc   : > { %v491_v9 = vpack.c.bf16 %v486_v6, %v486_v6  ;;  %v877_v10 = vpop.f32.mrb[3].mxu0  ;;  %v545_v23 = vpop.f32.mrb[0].mxu1 }
  0xfd   : > { %v546_v24 = vadd.f32 %v847_v22, %v545_v23  ;;  %v884_v25 = vpop.f32.mrb[1].mxu1 }
  0xfe   : > { %v559_v11 = vsel %vm554_vm2, %v491_v9, 0  ;;  %v548_v26 = vpop.f32.mrb[2].mxu1 }
  0xff   : > { %887 = vmatpush3.bf16.xpose.msra.mxu0 %v559_v11  ;;  %v551_v27 = vpack.c.bf16 %v546_v24, %v546_v24  ;;  %v885_v28 = vpop.f32.mrb[3].mxu1 }
 0x101   : > { %v619_v29 = vsel %vm617_vm4, %v551_v27, 0 }
 0x102   : > { %893 = vmatpush3.bf16.msra.mxu1 %v619_v29 }
 0x106   : > { %889 = vmatmul.mubr.msk.bf16.vlgmr.msra.gmra.mrb[4].mxu0 %vm554_vm2, %v552_v12 }
 0x1d9   : > { %v595_v16 = vpop.f32.mrb[4].mxu0 }
 0x1da   : > { %v596_v17 = vadd.f32 %v595_v16, %v553_v15  ;;  %v890_v18 = vpop.f32.mrb[5].mxu0 }
 0x1db   : > { %v598_v19 = vpop.f32.mrb[6].mxu0 }
 0x1dc   : > { %v891_v20 = vpop.f32.mrb[7].mxu0  ;;  %v602_v21 = vsel %vm601_vm3, %v596_v17, -inf }
 0x1dd   : > { %603 = vmax.xlane.f32.xlu0 %v602_v21 }
 0x26a   : > { %v604_v30 = vpop.xlane.xlu0 %603 }
 0x26b   : > { %v605_v31 = vsub.f32 %v596_v17, %v604_v30 }
 0x26d   : > { %v606_v32 = vmul.f32 1.442695, %v605_v31 }
 0x26f   : > { %975 = vpow2.f32 %v606_v32 }
 0x279   : > { %v976_v33 = vpop.eup %975 }
 0x27a   : > { %v608_v34 = vsel %vm601_vm3, %v976_v33, 0.0 }
 0x27b   : > { %609 = vadd.xlane.f32.xlu0 %v608_v34 }
 0x308   : > { %v610_v35 = vpop.xlane.xlu0 %609 }
 0x309   : > { %977 = vrcp.f32 %v610_v35 }
 0x313   : > { %v978_v36 = vpop.eup %977 }
 0x314   : > { %v612_v37 = vmul.f32 %v978_v36, %v976_v33 }
 0x316   : > { %v613_v38 = vpack.c.bf16 %v612_v37, %v612_v37 }
 0x318   : > { %895 = vmatmul.mubr.msk.bf16.vlgmr.msra.gmra.mrb[4].mxu1 %vm601_vm3, %v613_v38 }
 0x3eb   : > { %v655_v39 = vpop.f32.mrb[4].mxu1 }
 0x3ec   : > { %661 = vst.msk [vmem:[%s381_s13] sm:$0xff] %vm554_vm2, %v655_v39  ;;  %v896_v40 = vpop.f32.mrb[5].mxu1 }
 0x3ed   : > { %v658_v41 = vpop.f32.mrb[6].mxu1 }
 0x3ee   : > { %992 = shalt.err (!%p989_p7)
}
 0x3ef   : > { %s993_s20 = scalar_lea.hbm %s1241_s21, 128  ;;  %s997_s13 = scalar_lea.hbm %s1302_s7, 512 }
 0x3f0   : > { %p994_p9 = scmp.ne.s32.totalorder %s1241_s21, %s993_s20  ;;  %p998_p12 = scmp.lt.u32.totalorder %s1241_s21, %s1302_s7 }
 0x3f1   : > { %p999_p13 = scmp.lt.u32.totalorder %s997_s13, %s993_s20  ;;  %p1001_p1 = scmp.lt.u32.totalorder %s993_s20, %s1241_s21 }
 0x3f2   : > { %p995_p10 = pnand %p994_p9, %p1169_p3 }
 0x3f3   : > { %p1000_p0 = por %p999_p13, %p998_p12 }
 0x3f4   : > { %p996_p11 = pneg %p995_p10 }
 0x3f5   : > { %p1002_p2 = por %p1001_p1, %p1000_p0 }
 0x3f7   : > { %p1003_p4 = pnand %p1002_p2, %p996_p11 }
 0x3f9   : > { %1006 = shalt.err (!%p1003_p4)
}
 0x3fa   : > { %898 = dma.vmem_to_hbm [thread:$0]  (%p1169_p3), %s1243_s16, 128, %s1241_s21, %s663_s28   ;;  %v897_v42 = vpop.f32.mrb[7].mxu1 }
 0x3fb PF: > { %p904_p5 = scmp.ge.s32.totalorder %s1073_s8, 2  ;;  %s690_s27 = sand.u32 1, %s1045_s24  }
 0x3fc   : > { %s691_s22 = scalar_lea.sflag [#allocation3], %s690_s27 }
 0x3fd   : > { %p901_p6 = pnand %p904_p5, %p1178_p8 }
 0x3ff   : > { %1040 = dma.done.wait (!%p901_p6), %s691_s22, 128  }
 0x400   : > { %1042 = vsyncadd (!%p901_p6), %s691_s22, 4294967168  ;;  %s20_s8 = sadd.s32 1, %s1073_s8   ;;  %s1309_s24 = smov %s1049_s25 }
 0x401   : > { %p17_p7 = scmp.ge.s32.totalorder %s20_s8, 6   ;;  %s1310_s25 = smov %s1053_s26 }
 0x402   : > { %s1311_s26 = smov %s1187_s19  ;;  %s1312_s27 = smov %s1065_s29 }
 0x403   : > { %s1313_s28 = smov %s1069_s30  ;;  %s1314_s29 = smov %s1317_s11 }
 0x404   : > { %s1315_s30 = smov %s1321_s12  ;;  %19 = sbr.rel (!%p17_p7) target bundleno = 7 (0x7), region = 101 }
 0x40b   :  { %696 = vsyncpa [#allocation3], 1 }
 0x40c   :  { %698 = vsyncpa [#allocation3 + $0x1], 1 }

</bundles_post_ra>
